<compile_context>
chip_gen: v6e
topology: v6e:2x2x1
jax: 0.10.0
libtpu: 0.0.40
codegen_flags: <defaults>
</compile_context>

<pallas_src>
import functools

import jax
import jax.numpy as jnp
from jax.experimental import pallas as pl
from jax.experimental.pallas import tpu as pltpu


def _round_up(x, m):
    return ((x + m - 1) // m) * m


def _logits_block_budget_bytes():
    """Per-generation logits-block byte budget."""
    try:
        vmem = pltpu.get_tpu_info().vmem_capacity_bytes
    except Exception:
        vmem = 128 << 20
    if vmem <= (64 << 20):
        # v7x-class: ~3.2 TB/s HBM needs bigger blocks to amortize the fixed
        # per-grid-step overhead, but physical VMEM is only 64 MiB.
        return 6 << 20
    # v5e / v6e (128 MiB VMEM): ~4 MiB blocks reach ~90% of HBM roofline.
    return 4 << 20


def _ce2d_kernel(x_ref, cls_ref, acc_ref, *, hw_valid, tile_hw, strip,
                 tiles_per_part):
    """One (batch n, parallel part p, HW-tile h) grid step.

    x_ref:   (1, C, TILE_HW) logits block
    cls_ref: (1, 1, TILE_HW) int32 target class per pixel
    acc_ref: (1, 1, STRIP)   f32 per-(n,p) lane-wise loss accumulator
    """
    p = pl.program_id(1)
    h = pl.program_id(2)
    gt = p * tiles_per_part + h          # global HW-tile index (may be OOB)
    base = gt * tile_hw                  # global lane offset of this block

    @pl.when(h == 0)
    def _():
        acc_ref[...] = jnp.zeros_like(acc_ref)

    num_strips = tile_hw // strip

    def strip_body(s, carry):
        start = pl.multiple_of(s * strip, strip)
        x = x_ref[0, :, pl.ds(start, strip)].astype(jnp.float32)     # (C, S)
        cls = cls_ref[0, :, pl.ds(start, strip)]                     # (1, S)

        # log-softmax pieces over the channel (sublane) axis.
        m = jnp.max(x, axis=0, keepdims=True)                        # (1, S)
        e = x - m                                                    # (C, S)
        sum_exp = jnp.sum(jnp.exp(e), axis=0, keepdims=True)         # (1, S)

        # Pick e[target] per pixel via a one-hot select (no gather needed).
        iota_c = jax.lax.broadcasted_iota(jnp.int32, e.shape, 0)     # (C, S)
        picked_e = jnp.sum(jnp.where(iota_c == cls, e, 0.0),
                           axis=0, keepdims=True)                    # (1, S)

        # Mask lanes beyond the true H*W extent (ragged last tile / OOB part).
        lane = jax.lax.broadcasted_iota(jnp.int32, (1, strip), 1)    # (1, S)
        valid = (base + start + lane) < hw_valid
        per_pixel = jnp.where(valid, jnp.log(sum_exp) - picked_e, 0.0)

        # Lane-wise accumulation; cross-lane reduce happens once, outside.
        acc_ref[0] = acc_ref[0] + per_pixel
        return carry

    jax.lax.fori_loop(0, num_strips, strip_body, 0,
                      unroll=bool(num_strips <= 8))


def cross_entropy_loss_2d(outputs, targets, *, tile_hw=None,
                          num_parallel_parts=2):
    """outputs: (N, C, H, W) float logits (f32 or bf16).

    targets: either (N, C, H, W) float scores (class = argmax over channels,
    matching the PyTorch module) or an (N, H, W) integer class map.
    Returns a scalar f32 mean cross-entropy loss.
    """
    N, C, H, W = outputs.shape
    HW = H * W

    if targets.ndim == 4:
        # PyTorch `targets.argmax(dim=1)` — jnp.argmax has the same
        # first-occurrence tie-breaking.
        cls = jnp.argmax(targets, axis=1)
    else:
        cls = targets
    cls = cls.astype(jnp.int32).reshape(N, 1, HW)
    x = outputs.reshape(N, C, HW)          # free reshape (contiguous)

    # ---- Tile sizing (no wrapper-side padding; ragged last tile is masked). --
    itemsize = jnp.dtype(outputs.dtype).itemsize
    hw128 = _round_up(HW, 128)
    strip_target = 1024
    if tile_hw is None:
        budget = _logits_block_budget_bytes()
        lanes = budget // (C * itemsize)
        if lanes >= strip_target:
            lanes = (lanes // strip_target) * strip_target
        else:
            lanes = max(128, (lanes // 128) * 128)
        tile_hw = min(lanes, hw128)
    tile_hw = min(_round_up(tile_hw, 128), hw128)

    # Compute strip: largest power-of-two multiple of 128 dividing tile_hw.
    strip = next((s for s in (2048, 1024, 512, 256, 128) if tile_hw % s == 0),
                 tile_hw)

    num_tiles = pl.cdiv(HW, tile_hw)
    P = max(1, min(num_parallel_parts, num_tiles))
    tiles_per_part = pl.cdiv(num_tiles, P)

    kernel = functools.partial(_ce2d_kernel, hw_valid=HW, tile_hw=tile_hw,
                               strip=strip, tiles_per_part=tiles_per_part)

    def in_map(n, p, h):
        # Clamp so OOB (p, h) combinations re-read the last valid block
        # (its contribution is fully masked in-kernel).
        return (n, 0, jnp.minimum(p * tiles_per_part + h, num_tiles - 1))

    # Explicit VMEM budget: double-buffered inputs + output + headroom.
    block_bytes = C * tile_hw * itemsize + tile_hw * 4 + strip * 4
    vmem_limit = int(min(48 << 20, max(24 << 20, 2 * block_bytes + (16 << 20))))

    partials = pl.pallas_call(
        kernel,
        out_shape=jax.ShapeDtypeStruct((N, P, strip), jnp.float32),
        grid_spec=pltpu.PrefetchScalarGridSpec(
            num_scalar_prefetch=0,
            grid=(N, P, tiles_per_part),            # reduction axis (HW) last
            in_specs=[
                pl.BlockSpec((1, C, tile_hw), in_map),
                pl.BlockSpec((1, 1, tile_hw), in_map),
            ],
            # Per-(n, p) lane-dense accumulator, resident across the h axis.
            out_specs=pl.BlockSpec((1, 1, strip), lambda n, p, h: (n, p, 0)),
        ),
        compiler_params=pltpu.CompilerParams(
            dimension_semantics=("parallel", "parallel", "arbitrary"),
            vmem_limit_bytes=vmem_limit,
        ),
    )(x, cls)

    # Final tiny cross-lane reduce + mean normalization outside the kernel.
    return jnp.sum(partials) / jnp.float32(N * HW)


def _reference(outputs, targets):
    # Pure-JAX reference matching PyTorch CrossEntropyLoss2d semantics.
    logp = jax.nn.log_softmax(outputs.astype(jnp.float32), axis=1)  # (N,C,H,W)
    cls = jnp.argmax(targets, axis=1)                               # (N,H,W)
    picked = jnp.take_along_axis(logp, cls[:, None, :, :], axis=1)[:, 0]
    return -jnp.mean(picked)


if __name__ == "__main__":
    key = jax.random.PRNGKey(0)
    k1, k2 = jax.random.split(key)

    N, C, H, W = 2, 4, 16, 16
    outputs = jax.random.normal(k1, (N, C, H, W), dtype=jnp.float32)
    # Targets: random class map encoded as one-hot scores (argmax recovers it).
    cls = jax.random.randint(k2, (N, H, W), 0, C)
    targets = jax.nn.one_hot(cls, C, axis=1, dtype=jnp.float32)

    loss = jax.block_until_ready(cross_entropy_loss_2d(outputs, targets))
    ref = jax.block_until_ready(_reference(outputs, targets))

    assert jnp.allclose(loss, ref, rtol=1e-5, atol=1e-5), (loss, ref)
    print("KERNEL_OK")
</pallas_src>

<mosaic_0001>
module attributes {stable_mosaic.version = 11 : i64} {
  func.func @_ce2d_kernel(%arg0: i32, %arg1: i32, %arg2: i32, %arg3: memref<1x4x256xf32, #tpu.memory_space<vmem>>, %arg4: memref<1x1x256xi32, #tpu.memory_space<vmem>>, %arg5: memref<1x1x256xf32, #tpu.memory_space<vmem>>) attributes {dimension_semantics = [#tpu.dimension_semantics<parallel>, #tpu.dimension_semantics<parallel>, #tpu.dimension_semantics<arbitrary>], iteration_bounds = array<i64: 2, 1, 1>, scalar_prefetch = 0 : i64, scratch_operands = 0 : i64, tpu.core_type = #tpu.core_type<tc>, window_params = [{transform_indices = @transform_0, window_bounds = array<i64: 1, 4, 256>}, {transform_indices = @transform_1, window_bounds = array<i64: 1, 1, 256>}, {transform_indices = @transform_2, window_bounds = array<i64: 1, 1, 256>}]} {
    %c1_i32 = arith.constant 1 : i32
    %0 = arith.muli %arg1, %c1_i32 : i32
    %1 = arith.addi %0, %arg2 : i32
    %c256_i32 = arith.constant 256 : i32
    %2 = arith.muli %1, %c256_i32 : i32
    %c0_i32 = arith.constant 0 : i32
    %3 = arith.cmpi eq, %arg2, %c0_i32 : i32
    %4 = arith.extui %3 : i1 to i32
    %c0_i32_0 = arith.constant 0 : i32
    %5 = arith.cmpi ne, %4, %c0_i32_0 : i32
    scf.if %5 {
      %cst_18 = arith.constant 0.000000e+00 : f32
      %44 = vector.broadcast %cst_18 : f32 to vector<1x1x256xf32>
      %c0_19 = arith.constant 0 : index
      %c0_20 = arith.constant 0 : index
      %c0_21 = arith.constant 0 : index
      %45 = vector.load %arg5[%c0_19, %c0_20, %c0_21] : memref<1x1x256xf32, #tpu.memory_space<vmem>>, vector<1x1x256xf32>
      tpu.vector_store %arg5[%c0_19, %c0_20, %c0_21], %44 {strides = array<i32>} : memref<1x1x256xf32, #tpu.memory_space<vmem>>, vector<1x1x256xf32>,
    } else {
    }
    %c0_i32_1 = arith.constant 0 : i32
    %c256_i32_2 = arith.constant 256 : i32
    %6 = arith.muli %c0_i32_1, %c256_i32_2 : i32
    %7 = tpu.assume_multiple %6, 256 : i32
    %c0 = arith.constant 0 : index
    %c0_3 = arith.constant 0 : index
    %8 = arith.index_cast %7 : i32 to index
    %9 = vector.load %arg3[%c0, %c0_3, %8] : memref<1x4x256xf32, #tpu.memory_space<vmem>>, vector<1x4x256xf32>
    %10 = vector.shape_cast %9 : vector<1x4x256xf32> to vector<4x256xf32>
    %c0_4 = arith.constant 0 : index
    %c0_5 = arith.constant 0 : index
    %11 = arith.index_cast %7 : i32 to index
    %12 = vector.load %arg4[%c0_4, %c0_5, %11] : memref<1x1x256xi32, #tpu.memory_space<vmem>>, vector<1x1x256xi32>
    %13 = vector.shape_cast %12 : vector<1x1x256xi32> to vector<1x256xi32>
    %cst = arith.constant dense<0xFF800000> : vector<256xf32>
    %14 = vector.multi_reduction <maximumf>, %10, %cst [0] : vector<4x256xf32> to vector<256xf32>
    %15 = vector.shape_cast %14 : vector<256xf32> to vector<1x256xf32>
    %16 = vector.broadcast %15 : vector<1x256xf32> to vector<4x256xf32>
    %17 = arith.subf %10, %16 : vector<4x256xf32>
    %18 = math.exp %17 : vector<4x256xf32>
    %cst_6 = arith.constant dense<0.000000e+00> : vector<256xf32>
    %19 = vector.multi_reduction <add>, %18, %cst_6 [0] : vector<4x256xf32> to vector<256xf32>
    %20 = vector.shape_cast %19 : vector<256xf32> to vector<1x256xf32>
    %21 = tpu.iota {dimensions = array<i32: 0>} : vector<4x256xi32>
    %22 = vector.broadcast %13 : vector<1x256xi32> to vector<4x256xi32>
    %23 = arith.cmpi eq, %21, %22 : vector<4x256xi32>
    %cst_7 = arith.constant 0.000000e+00 : f32
    %24 = vector.broadcast %cst_7 : f32 to vector<4x256xf32>
    %25 = arith.select %23, %17, %24 : vector<4x256xi1>, vector<4x256xf32>
    %cst_8 = arith.constant dense<0.000000e+00> : vector<256xf32>
    %26 = vector.multi_reduction <add>, %25, %cst_8 [0] : vector<4x256xf32> to vector<256xf32>
    %27 = vector.shape_cast %26 : vector<256xf32> to vector<1x256xf32>
    %28 = tpu.iota {dimensions = array<i32: 1>} : vector<1x256xi32>
    %29 = arith.addi %2, %7 : i32
    %30 = vector.broadcast %29 : i32 to vector<1x256xi32>
    %31 = arith.addi %30, %28 : vector<1x256xi32>
    %c256_i32_9 = arith.constant 256 : i32
    %32 = vector.broadcast %c256_i32_9 : i32 to vector<1x256xi32>
    %33 = arith.cmpi slt, %31, %32 : vector<1x256xi32>
    %34 = math.log %20 : vector<1x256xf32>
    %35 = arith.subf %34, %27 : vector<1x256xf32>
    %cst_10 = arith.constant 0.000000e+00 : f32
    %36 = vector.broadcast %cst_10 : f32 to vector<1x256xf32>
    %37 = arith.select %33, %35, %36 : vector<1x256xi1>, vector<1x256xf32>
    %c0_11 = arith.constant 0 : index
    %c0_12 = arith.constant 0 : index
    %c0_13 = arith.constant 0 : index
    %38 = vector.load %arg5[%c0_11, %c0_12, %c0_13] : memref<1x1x256xf32, #tpu.memory_space<vmem>>, vector<1x1x256xf32>
    %39 = vector.shape_cast %38 : vector<1x1x256xf32> to vector<1x256xf32>
    %40 = arith.addf %39, %37 : vector<1x256xf32>
    %c0_14 = arith.constant 0 : index
    %c0_15 = arith.constant 0 : index
    %c0_16 = arith.constant 0 : index
    %41 = vector.load %arg5[%c0_14, %c0_15, %c0_16] : memref<1x1x256xf32, #tpu.memory_space<vmem>>, vector<1x1x256xf32>
    %42 = vector.shape_cast %41 : vector<1x1x256xf32> to vector<1x256xf32>
    %43 = vector.shape_cast %40 : vector<1x256xf32> to vector<1x1x256xf32>
    tpu.vector_store %arg5[%c0_14, %c0_15, %c0_16], %43 {strides = array<i32>} : memref<1x1x256xf32, #tpu.memory_space<vmem>>, vector<1x1x256xf32>,
    %c1_i32_17 = arith.constant 1 : i32
    return
  }
  func.func @transform_0(%arg0: i32, %arg1: i32, %arg2: i32) -> (i32, i32, i32) {
    %c1_i32 = arith.constant 1 : i32
    %0 = arith.muli %arg1, %c1_i32 : i32
    %1 = arith.addi %0, %arg2 : i32
    %c0_i32 = arith.constant 0 : i32
    %2 = arith.minsi %1, %c0_i32 : i32
    %c0_i32_0 = arith.constant 0 : i32
    %c0_i32_1 = arith.constant 0 : i32
    return %arg0, %c0_i32_0, %2 : i32, i32, i32
  }
  func.func @transform_1(%arg0: i32, %arg1: i32, %arg2: i32) -> (i32, i32, i32) {
    %c1_i32 = arith.constant 1 : i32
    %0 = arith.muli %arg1, %c1_i32 : i32
    %1 = arith.addi %0, %arg2 : i32
    %c0_i32 = arith.constant 0 : i32
    %2 = arith.minsi %1, %c0_i32 : i32
    %c0_i32_0 = arith.constant 0 : i32
    %c0_i32_1 = arith.constant 0 : i32
    return %arg0, %c0_i32_0, %2 : i32, i32, i32
  }
  func.func @transform_2(%arg0: i32, %arg1: i32, %arg2: i32) -> (i32, i32, i32) {
    %c0_i32 = arith.constant 0 : i32
    %c0_i32_0 = arith.constant 0 : i32
    return %arg0, %arg1, %c0_i32 : i32, i32, i32
  }
}

</mosaic_0001>

<bundles_post_ra>
// kernel: tpu_custom_call.1
= control target key start
LH: loop header
LB: loop body
LE: loop exit
PB: predicated region body
PF: predicated region fallthrough
CT: control target
= control target key end

     0   :  { %7 = vsyncpa [#allocation3], 0  ;;  %s958_s0 = inlined_call_operand.hbm [shape: f32[2,4,256], index: 0, kind: input, shape index: {}]   ;;  %s959_s1 = inlined_call_operand.hbm [shape: s32[2,1,256], index: 1, kind: input, shape index: {}]   ;;  %s960_s2 = inlined_call_operand.hbm [shape: f32[2,1,256], index: 2, kind: output, shape index: {}]  }
   0x1   :  { %9 = vsyncpa [#allocation3 + $0x1], 0 }
   0x2   :  { %10 = vsyncpa [#allocation6], 0 }
   0x3   :  { %12 = vsyncpa [#allocation6 + $0x1], 0 }
   0x4   :  { %13 = vsyncpa [#allocation4], 0 }
   0x5   :  { %15 = vsyncpa [#allocation4 + $0x1], 0  ;;  %s771_s9 = smov 0   ;;  %s773_s10 = smov 0  }
   0x6   :  { %s775_s11 = smov 0   ;;  %s777_s12 = smov 0  }
   0x7   :  { %s779_s13 = smov 0   ;;  %s781_s14 = smov 0  }
   0x8 LB: > { %s511_s15 = sadd.s32 4294967295, %s749_s14   ;;  %s512_s16 = sadd.s32 4294967294, %s749_s14   ;;  %s749_s14 = sphi %s781_s14, %s21_s14   ;;  %s745_s13 = sphi %s779_s13, %s974_s13   ;;  %s741_s12 = sphi %s777_s12, %s973_s12   ;;  %s737_s11 = sphi %s775_s11, %s972_s11   ;;  %s733_s10 = sphi %s773_s10, %s971_s10   ;;  %s729_s9 = sphi %s771_s9, %s970_s9  }
   0x9   : > { %s40_s17 = sadd.s32 1, %s745_s13  ;;  %s55_s18 = sadd.s32 1, %s737_s11 }
   0xa   : > { %p42_p0 = scmp.ge.s32.totalorder %s40_s17, 2  ;;  %p62_p1 = scmp.ne.s32.totalorder %s737_s11, %s733_s10 }
   0xb   : > { %p63_p2 = scmp.eq.s32.totalorder %s749_s14, 0  ;;  %p68_p3 = scmp.ne.s32.totalorder %s733_s10, %s729_s9 }
   0xc   : > { %s976_s17 = smov (%p42_p0, %s40_s17), 0  ;;  %p69_p5 = scmp.eq.s32.totalorder %s511_s15, 0 }
   0xd   : > { %p812_p4 = por %p63_p2, %p62_p1  ;;  %s50_s20 = ssub.s32 %s745_s13, %s976_s17 }
   0xe   : > { %p128_p6 = scmp.eq.s32.totalorder %s511_s15, 1  ;;  %p53_p7 = scmp.eq.s32.totalorder %s50_s20, 0 }
   0xf   : > { %p818_p8 = por %p69_p5, %p68_p3  ;;  %p134_p10 = scmp.eq.s32.totalorder %s512_s16, 1 }
  0x10   : > { %p822_p9 = por %p128_p6, %p62_p1  ;;  %p550_p13 = scmp.lt.s32.totalorder %s749_s14, 2 }
  0x11   : > { %s827_s23 = scalar_select %p53_p7, %s737_s11, %s55_s18  }
  0x12   : > { %p829_p11 = por %p134_p10, %p68_p3  ;;  %s836_s25 = sand.u32 1, %s737_s11  }
  0x13   : > { %s515_s26 = sshll.u32 %s836_s25, 3  ;;  %s530_s27 = sshll.u32 %s745_s13, 7 }
  0x14   : > { %s169_s30 = scalar_lea.hbm %s958_s0, %s530_s27  ;;  %s158_s3 = scalar_lea.vmem [#allocation2], %s515_s26 }
  0x15   : > { %s171_s4 = sshll.u32 %s158_s3, 4  ;;  %p845_p0 = pnand %p550_p13, %p812_p4  ;;  %s172_s4 = int_to_ptr.vmem [resolvable:$true] %s171_s4 }
  0x16   : > { %p521_p1 = scmp.ge.s32.totalorder %s749_s14, 1  ;;  %p200_p2 = scmp.lt.s32.totalorder %s749_s14, 3 }
  0x17   : > { %s155_s6 = scalar_lea.sflag [#allocation3], %s836_s25  ;;  %p611_p3 = pneg %p845_p0 }
  0x18   : > { %s622_s7 = scalar_lea.vmem %s172_s4, 128  ;;  %s751_s8 = smov [#allocation2]  }
  0x19   : > { %p623_p5 = scmp.ne.s32.totalorder %s172_s4, %s622_s7  ;;  %s627_s15 = sshll.u32 %s751_s8, 4  ;;  %s628_s15 = int_to_ptr.vmem [resolvable:$false] %s627_s15 }
  0x1a   : > { %s629_s16 = scalar_lea.vmem %s628_s15, 256  ;;  %p630_p4 = scmp.lt.s32.totalorder %s172_s4, %s628_s15 }
  0x1b   : > { %p625_p6 = pnand %p623_p5, %p611_p3  ;;  %p631_p10 = scmp.lt.s32.totalorder %s629_s16, %s622_s7 }
  0x1d   : > { %p626_p7 = pneg %p625_p6  ;;  %p632_p13 = por %p631_p10, %p630_p4 }
  0x1f   : > { %p633_p12 = pnand %p632_p13, %p626_p7 }
  0x21   : > { %636 = shalt.err (!%p633_p12)
}
  0x22   : > { %542 = dma.hbm_to_vmem [thread:$0]  (!%p845_p0), %s169_s30, 128, %s172_s4, %s155_s6  }
  0x23   : > { %p863_p5 = pnand %p521_p1, %p200_p2  ;;  %s518_s19 = sshll.u32 %s836_s25, 1 }
  0x24   : > { %s531_s20 = sshll.u32 %s745_s13, 5  ;;  %s182_s29 = scalar_lea.vmem [#allocation5], %s518_s19 }
  0x25   : > { %s193_s28 = scalar_lea.hbm %s959_s1, %s531_s20  ;;  %s195_s3 = sshll.u32 %s182_s29, 4  ;;  %s196_s3 = int_to_ptr.vmem [resolvable:$true] %s195_s3 }
  0x26   : > { %s179_s7 = scalar_lea.sflag [#allocation6], %s836_s25  ;;  %s650_s8 = scalar_lea.vmem %s196_s3, 32 }
  0x27   : > { %p651_p12 = scmp.ne.s32.totalorder %s196_s3, %s650_s8  ;;  %s752_s30 = smov [#allocation5]  }
  0x28   : > { %s655_s4 = sshll.u32 %s752_s30, 4  ;;  %s656_s4 = int_to_ptr.vmem [resolvable:$false] %s655_s4 }
  0x29   : > { %p653_p6 = pnand %p651_p12, %p611_p3  ;;  %s657_s6 = scalar_lea.vmem %s656_s4, 64 }
  0x2a   : > { %p658_p1 = scmp.lt.s32.totalorder %s196_s3, %s656_s4  ;;  %p659_p2 = scmp.lt.s32.totalorder %s657_s6, %s650_s8 }
  0x2b   : > { %p654_p7 = pneg %p653_p6 }
  0x2c   : > { %p660_p4 = por %p659_p2, %p658_p1 }
  0x2e   : > { %p661_p10 = pnand %p660_p4, %p654_p7 }
  0x30   : > { %664 = shalt.err (!%p661_p10)
}
  0x31   : > { %545 = dma.hbm_to_vmem [thread:$0]  (!%p845_p0), %s193_s28, 32, %s196_s3, %s179_s7  }
  0x32   : > { %204 = sbr.rel (%p863_p5) target bundleno = 149 (0x95), region = 28  ;;  %s881_s25 = sand.u32 (!%p863_p5), 1, %s733_s10  }
  0x33   : > { %s522_s15 = sshll.u32 (!%p863_p5), %s881_s25, 3  ;;  %s207_s16 = scalar_lea.sflag (!%p863_p5), [#allocation3], %s881_s25 }
  0x34   : > { %s210_s19 = scalar_lea.vmem (!%p863_p5), [#allocation2], %s522_s15 }
  0x37   : > { %716 = dma.done.wait (%p818_p8), %s207_s16, 128  }
  0x38   : > { %718 = vsyncadd (%p818_p8), %s207_s16, 4294967168  ;;  %s523_s5 = sshll.u32 %s881_s25, 1  ;;  %s216_s18 = scalar_lea.sflag [#allocation6], %s881_s25 }
  0x39   : > { %s891_s20 = scalar_lea.vmem [#allocation5], %s523_s5 }
  0x3a   : > { %720 = dma.done.wait (%p818_p8), %s216_s18, 32  }
  0x3b   : > { %722 = vsyncadd (%p818_p8), %s216_s18, 4294967264  ;;  %v259_v0 = vlaneseq  ;;  %s901_s26 = scalar_lea.vmem [#allocation7], %s523_s5  ;;  %v753_v2 = vmov 0.0   ;;  %vm269_vm1 = vcmask 1043456   ;;  %v264_v3 = vld [vmem:[%s210_s19] sm:$0xff]  ;;  %s532_s21 = sshll.u32 %s741_s12, 5 }
  0x3c   : > { %v267_v4 = vcombine.high %v264_v3, %v264_v3  ;;  %v270_v5 = vsel %vm269_vm1, %v264_v3, -inf  ;;  %v265_v24 = vld [vmem:[%s891_s20] sm:$0x3]  ;;  %v754_v59 = vmov 1966171168   ;;  %s398_s27 = sshll.u32 %s901_s26, 4  ;;  %s396_s3 = scalar_lea.hbm %s960_s2, %s532_s21  ;;  %s399_s27 = int_to_ptr.vmem [resolvable:$true] %s398_s27 }
  0x3d   : > { %vm897_vm0 = vcmp.lt.s32.totalorder %v259_v0, 256  ;;  %v271_v6 = vrot.slane %v270_v5, 4  ;;  %v309_v22 = vshrl.u32 %v259_v0, 7  ;;  %v361_v60 = vunpack.c.l.s4 %v754_v59  ;;  %s382_s7 = scalar_lea.sflag [#allocation4], %s881_s25  ;;  %s665_s8 = scalar_lea.vmem %s399_s27, 32 }
  0x3e   : > { %263 = vst.msk [vmem:[%s901_s26] sm:$0x3] %vm897_vm0, %v753_v2  ;;  %v277_v7 = vsel %vm269_vm1, %v267_v4, -inf  ;;  %p666_p8 = scmp.ne.s32.totalorder %s399_s27, %s665_s8  ;;  %s755_s30 = smov [#allocation7]  }
  0x3f   : > { %v272_v8 = vmax.f32 %v270_v5, %v271_v6  ;;  %v278_v9 = vrot.slane %v277_v7, 4  ;;  %v312_v23 = vsub.s32 0, %v309_v22  ;;  %v316_v25 = vsub.s32 1, %v309_v22  ;;  %s669_s4 = sshll.u32 %s755_s30, 4  ;;  %s670_s4 = int_to_ptr.vmem [resolvable:$false] %s669_s4 }
  0x40   : > { %v362_v2 = vunpack.c.0.s8 %v361_v60  ;;  %p667_p0 = pnand %p666_p8, %p822_p9  ;;  %s671_s12 = scalar_lea.vmem %s670_s4, 64 }
  0x41   : > { %v273_v10 = vrot.slane %v272_v8, 2  ;;  %v279_v11 = vmax.f32 %v277_v7, %v278_v9  ;;  %v313_v26 = vrot.slane %v265_v24, %v312_v23  ;;  %v317_v27 = vrot.slane %v265_v24, %v316_v25  ;;  %p672_p13 = scmp.lt.s32.totalorder %s399_s27, %s670_s4  ;;  %p673_p5 = scmp.lt.s32.totalorder %s671_s12, %s665_s8 }
  0x42   : > { %v365_v7 = vsub.s32 %v362_v2, %v309_v22  ;;  %p668_p3 = pneg %p667_p0 }
  0x43   : > { %v274_v12 = vmax.f32 %v272_v8, %v273_v10  ;;  %v280_v13 = vrot.slane %v279_v11, 2  ;;  %vm318_vm2 = vcmp.eq.s32.totalorder %v309_v22, %v313_v26  ;;  %vm319_vm3 = vcmp.eq.s32.totalorder %v309_v22, %v317_v27  ;;  %p674_p12 = por %p673_p5, %p672_p13 }
  0x45   : > { %v275_v14 = vrot.slane %v274_v12, 1  ;;  %v281_v15 = vmax.f32 %v279_v11, %v280_v13  ;;  %v356_v10 = vld [vmem:[%s901_s26] sm:$0x3]  ;;  %p675_p6 = pnand %p674_p12, %p668_p3 }
  0x47   : > { %v276_v16 = vmax.f32 %v274_v12, %v275_v14  ;;  %v282_v17 = vrot.slane %v281_v15, 1 }
  0x49   : > { %v283_v18 = vmax.f32 %v281_v15, %v282_v17 }
  0x4b   : > { %v286_v19 = vcombine.low %v276_v16, %v283_v18 }
  0x4d   : > { %v288_v20 = vsub.f32 %v264_v3, %v286_v19 }
  0x4f   : > { %v289_v21 = vmul.f32 1.442695, %v288_v20  ;;  %v321_v28 = vcombine.high %v288_v20, %v288_v20  ;;  %v323_v30 = vsel %vm318_vm2, %v288_v20, 0.0 }
  0x50   : > { %v325_v36 = vsel %vm269_vm1, %v323_v30, 0.0 }
  0x51   : > { %603 = vpow2.f32 %v289_v21  ;;  %v324_v34 = vsel %vm319_vm3, %v321_v28, 0.0  ;;  %v326_v42 = vrot.slane %v325_v36, 4 }
  0x52   : > { %v332_v39 = vsel %vm269_vm1, %v324_v34, 0.0 }
  0x53   : > { %v333_v45 = vrot.slane %v332_v39, 4  ;;  %v327_v48 = vadd.f32 %v326_v42, %v325_v36 }
  0x55   : > { %v334_v51 = vadd.f32 %v333_v45, %v332_v39  ;;  %v328_v53 = vrot.slane %v327_v48, 2 }
  0x57   : > { %v335_v54 = vrot.slane %v334_v51, 2  ;;  %v329_v55 = vadd.f32 %v328_v53, %v327_v48 }
  0x59   : > { %v336_v56 = vadd.f32 %v335_v54, %v334_v51  ;;  %v330_v57 = vrot.slane %v329_v55, 1 }
  0x5b   : > { %v337_v58 = vrot.slane %v336_v56, 1  ;;  %v331_v61 = vadd.f32 %v330_v57, %v329_v55 }
  0x5d   : > { %v338_v63 = vadd.f32 %v337_v58, %v336_v56 }
  0x5e   : > { %v604_v29 = vpop.eup %603 }
  0x5f   : > { %v292_v31 = vcombine.high %v604_v29, %v604_v29  ;;  %v294_v32 = vsel %vm269_vm1, %v604_v29, 0.0 }
  0x60   : > { %v295_v33 = vrot.slane %v294_v32, 4 }
  0x61   : > { %v301_v35 = vsel %vm269_vm1, %v292_v31, 0.0 }
  0x62   : > { %v296_v37 = vadd.f32 %v295_v33, %v294_v32  ;;  %v302_v38 = vrot.slane %v301_v35, 4 }
  0x64   : > { %v297_v40 = vrot.slane %v296_v37, 2  ;;  %v303_v41 = vadd.f32 %v302_v38, %v301_v35 }
  0x66   : > { %v298_v43 = vadd.f32 %v297_v40, %v296_v37  ;;  %v304_v44 = vrot.slane %v303_v41, 2 }
  0x68   : > { %v299_v46 = vrot.slane %v298_v43, 1  ;;  %v305_v47 = vadd.f32 %v304_v44, %v303_v41 }
  0x6a   : > { %v300_v49 = vadd.f32 %v299_v46, %v298_v43  ;;  %v306_v50 = vrot.slane %v305_v47, 1 }
  0x6c   : > { %v307_v52 = vadd.f32 %v306_v50, %v305_v47  ;;  %605 = vlog2.f32 %v300_v49 }
  0x6e   : > { %607 = vlog2.f32 %v307_v52 }
  0x79   : > { %v606_v62 = vpop.eup %605 }
  0x7a   : > { %v349_v0 = vmul.f32 0.6931472, %v606_v62 }
  0x7b   : > { %v608_v3 = vpop.eup %607 }
  0x7c   : > { %v351_v4 = vmul.f32 0.6931472, %v608_v3  ;;  %v352_v5 = vsub.f32 %v349_v0, %v331_v61 }
  0x7e   : > { %v353_v6 = vsub.f32 %v351_v4, %v338_v63 }
  0x80   : > { %v359_v8 = vcombine.low %v352_v5, %v353_v6 }
  0x82   : > { %v366_v9 = vrot.slane %v359_v8, %v365_v7 }
  0x84   : > { %v373_v11 = vrot.slane %v366_v9, %v365_v7 }
  0x86   : > { %v375_v12 = vadd.f32 %v373_v11, %v356_v10 }
  0x88   : > { %380 = vst.msk [vmem:[%s901_s26] sm:$0x3] %vm897_vm0, %v375_v12 }
  0x89   : > { %678 = shalt.err (!%p675_p6)
}
  0x8a   : > { %s679_s6 = scalar_lea.hbm %s396_s3, 32  ;;  %s683_s16 = scalar_lea.hbm %s960_s2, 64 }
  0x8b   : > { %p680_p7 = scmp.ne.s32.totalorder %s396_s3, %s679_s6  ;;  %p684_p4 = scmp.lt.s32.totalorder %s396_s3, %s960_s2 }
  0x8c   : > { %p685_p10 = scmp.lt.s32.totalorder %s683_s16, %s679_s6 }
  0x8d   : > { %p681_p1 = pnand %p680_p7, %p822_p9 }
  0x8e   : > { %p686_p8 = por %p685_p10, %p684_p4 }
  0x8f   : > { %p682_p2 = pneg %p681_p1 }
  0x91   : > { %p687_p0 = pnand %p686_p8, %p682_p2 }
  0x93   : > { %690 = shalt.err (!%p687_p0)
}
  0x94   : > { %537 = dma.vmem_to_hbm [thread:$0]  (%p822_p9), %s399_s27, 32, %s396_s3, %s382_s7  }
  0x95 PF: > { %s410_s18 = sand.u32 1, %s729_s9   ;;  %p969_p3 = scmp.ge.s32.totalorder %s749_s14, 2 }
  0x96   : > { %s411_s20 = scalar_lea.sflag [#allocation4], %s410_s18 }
  0x97   : > { %p547_p13 = pnand %p969_p3, %p829_p11 }
  0x99   : > { %p548_p5 = pneg %p547_p13 }
  0x9b   : > { %724 = dma.done.wait (%p548_p5), %s411_s20, 32  }
  0x9c   : > { %726 = vsyncadd (%p548_p5), %s411_s20, 4294967264  ;;  %s21_s14 = sadd.s32 1, %s749_s14   ;;  %s970_s9 = smov %s733_s10 }
  0x9d   : > { %p18_p12 = scmp.ge.s32.totalorder %s21_s14, 4   ;;  %s971_s10 = smov %s737_s11 }
  0x9e   : > { %s972_s11 = smov %s827_s23  ;;  %s973_s12 = smov %s745_s13 }
  0x9f   : > { %s974_s13 = smov %s976_s17  ;;  %20 = sbr.rel (!%p18_p12) target bundleno = 8 (0x8), region = 90 }
  0xa4   :  { %416 = vsyncpa [#allocation3], 1 }
  0xa5   :  { %418 = vsyncpa [#allocation3 + $0x1], 1 }
  0xa6   :  { %419 = vsyncpa [#allocation6], 1 }
  0xa7   :  { %421 = vsyncpa [#allocation6 + $0x1], 1 }
  0xa8   :  { %422 = vsyncpa [#allocation4], 1 }
  0xa9   :  { %424 = vsyncpa [#allocation4 + $0x1], 1 }

</bundles_post_ra>
